<compile_context>
chip_gen: v7x
topology: tpu7x:2x2x1
jax: 0.10.0
libtpu: 0.0.40
codegen_flags: <defaults>
</compile_context>

<pallas_src>
import jax
import jax.numpy as jnp
from jax.experimental import pallas as pl
from jax.experimental.pallas import tpu as pltpu

IN_FEATURES = 28 * 28          # 784
HIDDEN = 64
NUM_CLASSES = 10
OUT_PAD = 128                  # lane-dense padded logit width
NEG_BIG = -1e30                # pad-lane bias -> exp() underflows to exactly 0


def mlp_logsoftmax_kernel(x_ref,
                          w1_ref, b1_ref,
                          w2_ref, b2_ref,
                          w3_ref, b3_ref,
                          w4_ref, b4_ref,
                          o_ref):
    """One batch tile: 4 x (MXU matmul + bias) with relu, then stable log-softmax."""
    x = x_ref[...]                                                     # (TB, 784) bf16

    # fc1 + relu
    h = jnp.dot(x, w1_ref[...], preferred_element_type=jnp.float32) + b1_ref[...]
    h = jnp.maximum(h, 0.0).astype(jnp.bfloat16)
    # fc2 + relu
    h = jnp.dot(h, w2_ref[...], preferred_element_type=jnp.float32) + b2_ref[...]
    h = jnp.maximum(h, 0.0).astype(jnp.bfloat16)
    # fc3 + relu
    h = jnp.dot(h, w3_ref[...], preferred_element_type=jnp.float32) + b3_ref[...]
    h = jnp.maximum(h, 0.0).astype(jnp.bfloat16)

    # fc4: logits padded to 128 lanes.  Pad-lane biases are -1e30, so their
    # exp() is exactly 0 and the log-softmax reduction below is effectively
    # over the 10 real logits only (no masking needed, no corruption).
    logits = jnp.dot(h, w4_ref[...], preferred_element_type=jnp.float32) + b4_ref[...]

    # numerically stable log-softmax over the last axis
    m = jnp.max(logits, axis=-1, keepdims=True)
    shifted = logits - m
    lse = jnp.log(jnp.sum(jnp.exp(shifted), axis=-1, keepdims=True))
    o_ref[...] = shifted - lse          # (TB, 128) f32; lanes 10..127 sliced off outside


def net_forward(x, params, *, tile_b=512):
    """x: (B, 784) float32 -> (B, 10) float32 log-probabilities."""
    (w1, b1), (w2, b2), (w3, b3), (w4, b4) = params
    B, K = x.shape
    assert K == IN_FEATURES

    # bf16 operands for the MXU; biases / accumulation stay f32.
    x = x.astype(jnp.bfloat16)
    w1b = w1.astype(jnp.bfloat16)
    w2b = w2.astype(jnp.bfloat16)
    w3b = w3.astype(jnp.bfloat16)
    # Pad fc4 to a lane-dense 128-wide output; pad-lane biases get -1e30 so the
    # padded logits vanish under the softmax.
    w4p = jnp.zeros((HIDDEN, OUT_PAD), jnp.bfloat16).at[:, :NUM_CLASSES].set(
        w4.astype(jnp.bfloat16))
    b4p = jnp.full((1, OUT_PAD), NEG_BIG, jnp.float32).at[:, :NUM_CLASSES].set(
        b4.astype(jnp.float32))

    # Batch tile: multiple of 8 (sublane), no bigger than the (rounded-up) batch.
    tile_b = max(8, (int(tile_b) // 8) * 8)
    tile_b = min(tile_b, ((B + 7) // 8) * 8)
    grid_b = pl.cdiv(B, tile_b)
    b_pad = grid_b * tile_b
    if b_pad != B:
        x = jnp.pad(x, ((0, b_pad - B), (0, 0)))

    const = lambda i: (0, 0)   # weights/biases: same block every step -> VMEM-resident

    out = pl.pallas_call(
        mlp_logsoftmax_kernel,
        out_shape=jax.ShapeDtypeStruct((b_pad, OUT_PAD), jnp.float32),
        grid=(grid_b,),
        in_specs=[
            pl.BlockSpec((tile_b, IN_FEATURES), lambda i: (i, 0)),   # streamed x tile
            pl.BlockSpec(w1b.shape, const), pl.BlockSpec(b1.shape, const),
            pl.BlockSpec(w2b.shape, const), pl.BlockSpec(b2.shape, const),
            pl.BlockSpec(w3b.shape, const), pl.BlockSpec(b3.shape, const),
            pl.BlockSpec(w4p.shape, const), pl.BlockSpec(b4p.shape, const),
        ],
        out_specs=pl.BlockSpec((tile_b, OUT_PAD), lambda i: (i, 0)),
        compiler_params=pltpu.CompilerParams(
            dimension_semantics=("parallel",)),
    )(x, w1b, b1, w2b, b2, w3b, b3, w4p, b4p)

    return out[:B, :NUM_CLASSES]


def init_params(key):
    """Deterministic init matching the torch module's layer shapes.

    torch fc weight (out, in) -> stored here transposed as (in, out).
    Biases kept 2D (1, out) for TPU-friendly broadcasting in the kernel.
    """
    dims = [(IN_FEATURES, HIDDEN), (HIDDEN, HIDDEN), (HIDDEN, HIDDEN), (HIDDEN, NUM_CLASSES)]
    params = []
    for fan_in, fan_out in dims:
        key, kw, kb = jax.random.split(key, 3)
        bound = 1.0 / jnp.sqrt(fan_in)  # same scale as torch's default Linear init
        w = jax.random.uniform(kw, (fan_in, fan_out), jnp.float32, -bound, bound)
        b = jax.random.uniform(kb, (1, fan_out), jnp.float32, -bound, bound)
        params.append((w, b))
    return params


def reference_forward(x, params):
    """Pure-JAX reference using the same bf16-operand / f32-accumulate recipe."""
    (w1, b1), (w2, b2), (w3, b3), (w4, b4) = params

    def lin(h, w, b):
        return jnp.dot(h.astype(jnp.bfloat16), w.astype(jnp.bfloat16),
                       preferred_element_type=jnp.float32) + b

    h = jnp.maximum(lin(x, w1, b1), 0.0)
    h = jnp.maximum(lin(h, w2, b2), 0.0)
    h = jnp.maximum(lin(h, w3, b3), 0.0)
    logits = lin(h, w4, b4)
    return jax.nn.log_softmax(logits, axis=-1)


if __name__ == "__main__":
    key = jax.random.PRNGKey(0)
    key, kx1, kx2 = jax.random.split(key, 3)
    params = init_params(key)

    # Small single-tile case.
    B1 = 8
    x1 = jax.random.normal(kx1, (B1, IN_FEATURES), jnp.float32)
    out1 = jax.block_until_ready(net_forward(x1, params))
    ref1 = reference_forward(x1, params)
    assert out1.shape == (B1, NUM_CLASSES)
    assert jnp.allclose(out1, ref1, atol=1e-3, rtol=1e-3)

    # Multi-tile case: exercises the batch grid / resident-weight pipeline.
    B2 = 64
    x2 = jax.random.normal(kx2, (B2, IN_FEATURES), jnp.float32)
    out2 = jax.block_until_ready(net_forward(x2, params, tile_b=16))
    ref2 = reference_forward(x2, params)
    assert out2.shape == (B2, NUM_CLASSES)
    assert jnp.allclose(out2, ref2, atol=1e-3, rtol=1e-3)

    print("KERNEL_OK")
</pallas_src>

<mosaic_0001>
module attributes {stable_mosaic.version = 11 : i64} {
  func.func @mlp_logsoftmax_kernel(%arg0: i32, %arg1: memref<8x784xbf16, #tpu.memory_space<vmem>>, %arg2: memref<784x64xbf16, #tpu.memory_space<vmem>>, %arg3: memref<1x64xf32, #tpu.memory_space<vmem>>, %arg4: memref<64x64xbf16, #tpu.memory_space<vmem>>, %arg5: memref<1x64xf32, #tpu.memory_space<vmem>>, %arg6: memref<64x64xbf16, #tpu.memory_space<vmem>>, %arg7: memref<1x64xf32, #tpu.memory_space<vmem>>, %arg8: memref<64x128xbf16, #tpu.memory_space<vmem>>, %arg9: memref<1x128xf32, #tpu.memory_space<vmem>>, %arg10: memref<8x128xf32, #tpu.memory_space<vmem>>) attributes {dimension_semantics = [#tpu.dimension_semantics<parallel>], iteration_bounds = array<i64: 1>, scalar_prefetch = 0 : i64, scratch_operands = 0 : i64, tpu.core_type = #tpu.core_type<tc>, window_params = [{transform_indices = @transform_0, window_bounds = array<i64: 8, 784>}, {pipeline_mode = #tpu.pipeline_mode<synchronous>, transform_indices = @transform_1, window_bounds = array<i64: 784, 64>}, {pipeline_mode = #tpu.pipeline_mode<synchronous>, transform_indices = @transform_2, window_bounds = array<i64: 1, 64>}, {pipeline_mode = #tpu.pipeline_mode<synchronous>, transform_indices = @transform_3, window_bounds = array<i64: 64, 64>}, {pipeline_mode = #tpu.pipeline_mode<synchronous>, transform_indices = @transform_4, window_bounds = array<i64: 1, 64>}, {pipeline_mode = #tpu.pipeline_mode<synchronous>, transform_indices = @transform_5, window_bounds = array<i64: 64, 64>}, {pipeline_mode = #tpu.pipeline_mode<synchronous>, transform_indices = @transform_6, window_bounds = array<i64: 1, 64>}, {pipeline_mode = #tpu.pipeline_mode<synchronous>, transform_indices = @transform_7, window_bounds = array<i64: 64, 128>}, {pipeline_mode = #tpu.pipeline_mode<synchronous>, transform_indices = @transform_8, window_bounds = array<i64: 1, 128>}, {transform_indices = @transform_9, window_bounds = array<i64: 8, 128>}]} {
    %c0 = arith.constant 0 : index
    %c0_0 = arith.constant 0 : index
    %0 = vector.load %arg1[%c0, %c0_0] : memref<8x784xbf16, #tpu.memory_space<vmem>>, vector<8x784xbf16>
    %c0_1 = arith.constant 0 : index
    %c0_2 = arith.constant 0 : index
    %1 = vector.load %arg2[%c0_1, %c0_2] : memref<784x64xbf16, #tpu.memory_space<vmem>>, vector<784x64xbf16>
    %cst = arith.constant dense<0.000000e+00> : vector<8x64xf32>
    %2 = tpu.matmul %0, %1, %cst {dimension_numbers = #tpu.dot_dimension_numbers<[1], [0], [0], [1], [0, 0, 1, 1], [], []>} : vector<8x784xbf16>, vector<784x64xbf16>, vector<8x64xf32> -> vector<8x64xf32>
    %c0_3 = arith.constant 0 : index
    %c0_4 = arith.constant 0 : index
    %3 = vector.load %arg3[%c0_3, %c0_4] : memref<1x64xf32, #tpu.memory_space<vmem>>, vector<1x64xf32>
    %4 = vector.broadcast %3 : vector<1x64xf32> to vector<8x64xf32>
    %5 = arith.addf %2, %4 : vector<8x64xf32>
    %cst_5 = arith.constant 0.000000e+00 : f32
    %6 = vector.broadcast %cst_5 : f32 to vector<8x64xf32>
    %7 = arith.maximumf %5, %6 : vector<8x64xf32>
    %8 = arith.truncf %7 : vector<8x64xf32> to vector<8x64xbf16>
    %c0_6 = arith.constant 0 : index
    %c0_7 = arith.constant 0 : index
    %9 = vector.load %arg4[%c0_6, %c0_7] : memref<64x64xbf16, #tpu.memory_space<vmem>>, vector<64x64xbf16>
    %cst_8 = arith.constant dense<0.000000e+00> : vector<8x64xf32>
    %10 = tpu.matmul %8, %9, %cst_8 {dimension_numbers = #tpu.dot_dimension_numbers<[1], [0], [0], [1], [0, 0, 1, 1], [], []>} : vector<8x64xbf16>, vector<64x64xbf16>, vector<8x64xf32> -> vector<8x64xf32>
    %c0_9 = arith.constant 0 : index
    %c0_10 = arith.constant 0 : index
    %11 = vector.load %arg5[%c0_9, %c0_10] : memref<1x64xf32, #tpu.memory_space<vmem>>, vector<1x64xf32>
    %12 = vector.broadcast %11 : vector<1x64xf32> to vector<8x64xf32>
    %13 = arith.addf %10, %12 : vector<8x64xf32>
    %cst_11 = arith.constant 0.000000e+00 : f32
    %14 = vector.broadcast %cst_11 : f32 to vector<8x64xf32>
    %15 = arith.maximumf %13, %14 : vector<8x64xf32>
    %16 = arith.truncf %15 : vector<8x64xf32> to vector<8x64xbf16>
    %c0_12 = arith.constant 0 : index
    %c0_13 = arith.constant 0 : index
    %17 = vector.load %arg6[%c0_12, %c0_13] : memref<64x64xbf16, #tpu.memory_space<vmem>>, vector<64x64xbf16>
    %cst_14 = arith.constant dense<0.000000e+00> : vector<8x64xf32>
    %18 = tpu.matmul %16, %17, %cst_14 {dimension_numbers = #tpu.dot_dimension_numbers<[1], [0], [0], [1], [0, 0, 1, 1], [], []>} : vector<8x64xbf16>, vector<64x64xbf16>, vector<8x64xf32> -> vector<8x64xf32>
    %c0_15 = arith.constant 0 : index
    %c0_16 = arith.constant 0 : index
    %19 = vector.load %arg7[%c0_15, %c0_16] : memref<1x64xf32, #tpu.memory_space<vmem>>, vector<1x64xf32>
    %20 = vector.broadcast %19 : vector<1x64xf32> to vector<8x64xf32>
    %21 = arith.addf %18, %20 : vector<8x64xf32>
    %cst_17 = arith.constant 0.000000e+00 : f32
    %22 = vector.broadcast %cst_17 : f32 to vector<8x64xf32>
    %23 = arith.maximumf %21, %22 : vector<8x64xf32>
    %24 = arith.truncf %23 : vector<8x64xf32> to vector<8x64xbf16>
    %c0_18 = arith.constant 0 : index
    %c0_19 = arith.constant 0 : index
    %25 = vector.load %arg8[%c0_18, %c0_19] : memref<64x128xbf16, #tpu.memory_space<vmem>>, vector<64x128xbf16>
    %cst_20 = arith.constant dense<0.000000e+00> : vector<8x128xf32>
    %26 = tpu.matmul %24, %25, %cst_20 {dimension_numbers = #tpu.dot_dimension_numbers<[1], [0], [0], [1], [0, 0, 1, 1], [], []>} : vector<8x64xbf16>, vector<64x128xbf16>, vector<8x128xf32> -> vector<8x128xf32>
    %c0_21 = arith.constant 0 : index
    %c0_22 = arith.constant 0 : index
    %27 = vector.load %arg9[%c0_21, %c0_22] : memref<1x128xf32, #tpu.memory_space<vmem>>, vector<1x128xf32>
    %28 = vector.broadcast %27 : vector<1x128xf32> to vector<8x128xf32>
    %29 = arith.addf %26, %28 : vector<8x128xf32>
    %cst_23 = arith.constant dense<0xFF800000> : vector<8xf32>
    %30 = vector.multi_reduction <maximumf>, %29, %cst_23 [1] : vector<8x128xf32> to vector<8xf32>
    %31 = vector.shape_cast %30 : vector<8xf32> to vector<8x1xf32>
    %32 = vector.broadcast %31 : vector<8x1xf32> to vector<8x128xf32>
    %33 = arith.subf %29, %32 : vector<8x128xf32>
    %34 = math.exp %33 : vector<8x128xf32>
    %cst_24 = arith.constant dense<0.000000e+00> : vector<8xf32>
    %35 = vector.multi_reduction <add>, %34, %cst_24 [1] : vector<8x128xf32> to vector<8xf32>
    %36 = vector.shape_cast %35 : vector<8xf32> to vector<8x1xf32>
    %37 = math.log %36 : vector<8x1xf32>
    %38 = vector.broadcast %37 : vector<8x1xf32> to vector<8x128xf32>
    %39 = arith.subf %33, %38 : vector<8x128xf32>
    %c0_25 = arith.constant 0 : index
    %c0_26 = arith.constant 0 : index
    %40 = vector.load %arg10[%c0_25, %c0_26] : memref<8x128xf32, #tpu.memory_space<vmem>>, vector<8x128xf32>
    tpu.vector_store %arg10[%c0_25, %c0_26], %39 {strides = array<i32>} : memref<8x128xf32, #tpu.memory_space<vmem>>, vector<8x128xf32>,
    return
  }
  func.func @transform_0(%arg0: i32) -> (i32, i32) {
    %c0_i32 = arith.constant 0 : i32
    %c0_i32_0 = arith.constant 0 : i32
    return %arg0, %c0_i32 : i32, i32
  }
  func.func @transform_1(%arg0: i32) -> (i32, i32) {
    %c0_i32 = arith.constant 0 : i32
    %c0_i32_0 = arith.constant 0 : i32
    %c0_i32_1 = arith.constant 0 : i32
    return %c0_i32, %c0_i32_0 : i32, i32
  }
  func.func @transform_2(%arg0: i32) -> (i32, i32) {
    %c0_i32 = arith.constant 0 : i32
    %c0_i32_0 = arith.constant 0 : i32
    %c0_i32_1 = arith.constant 0 : i32
    return %c0_i32, %c0_i32_0 : i32, i32
  }
  func.func @transform_3(%arg0: i32) -> (i32, i32) {
    %c0_i32 = arith.constant 0 : i32
    %c0_i32_0 = arith.constant 0 : i32
    %c0_i32_1 = arith.constant 0 : i32
    return %c0_i32, %c0_i32_0 : i32, i32
  }
  func.func @transform_4(%arg0: i32) -> (i32, i32) {
    %c0_i32 = arith.constant 0 : i32
    %c0_i32_0 = arith.constant 0 : i32
    %c0_i32_1 = arith.constant 0 : i32
    return %c0_i32, %c0_i32_0 : i32, i32
  }
  func.func @transform_5(%arg0: i32) -> (i32, i32) {
    %c0_i32 = arith.constant 0 : i32
    %c0_i32_0 = arith.constant 0 : i32
    %c0_i32_1 = arith.constant 0 : i32
    return %c0_i32, %c0_i32_0 : i32, i32
  }
  func.func @transform_6(%arg0: i32) -> (i32, i32) {
    %c0_i32 = arith.constant 0 : i32
    %c0_i32_0 = arith.constant 0 : i32
    %c0_i32_1 = arith.constant 0 : i32
    return %c0_i32, %c0_i32_0 : i32, i32
  }
  func.func @transform_7(%arg0: i32) -> (i32, i32) {
    %c0_i32 = arith.constant 0 : i32
    %c0_i32_0 = arith.constant 0 : i32
    %c0_i32_1 = arith.constant 0 : i32
    return %c0_i32, %c0_i32_0 : i32, i32
  }
  func.func @transform_8(%arg0: i32) -> (i32, i32) {
    %c0_i32 = arith.constant 0 : i32
    %c0_i32_0 = arith.constant 0 : i32
    %c0_i32_1 = arith.constant 0 : i32
    return %c0_i32, %c0_i32_0 : i32, i32
  }
  func.func @transform_9(%arg0: i32) -> (i32, i32) {
    %c0_i32 = arith.constant 0 : i32
    %c0_i32_0 = arith.constant 0 : i32
    return %arg0, %c0_i32 : i32, i32
  }
}

</mosaic_0001>

<bundles_post_ra>
// kernel: tpu_custom_call.1
= control target key start
LH: loop header
LB: loop body
LE: loop exit
PB: predicated region body
PF: predicated region fallthrough
CT: control target
= control target key end

     0   :  { %v1203_v43 = vmov 0.0   ;;  %vm1204_vm0 = vmmov 0   ;;  %vm461_vm1 = vcmask 130048   ;;  %s1499_s0 = inlined_call_operand.vmem [shape: bf16[8,784], index: 0, kind: input, shape index: {}]   ;;  %s1500_s1 = inlined_call_operand.vmem [shape: bf16[784,64], index: 1, kind: input, shape index: {}]   ;;  %s1501_s2 = inlined_call_operand.vmem [shape: f32[1,64], index: 2, kind: input, shape index: {}]   ;;  %s1502_s3 = inlined_call_operand.vmem [shape: bf16[64,64], index: 3, kind: input, shape index: {}]   ;;  %s1503_s4 = inlined_call_operand.vmem [shape: f32[1,64], index: 4, kind: input, shape index: {}]   ;;  %s1504_s5 = inlined_call_operand.vmem [shape: bf16[64,64], index: 5, kind: input, shape index: {}]   ;;  %s1505_s6 = inlined_call_operand.vmem [shape: f32[1,64], index: 6, kind: input, shape index: {}]   ;;  %s1506_s7 = inlined_call_operand.vmem [shape: bf16[64,128], index: 7, kind: input, shape index: {}]   ;;  %s1507_s8 = inlined_call_operand.vmem [shape: f32[1,128], index: 8, kind: input, shape index: {}]   ;;  %s1508_s9 = inlined_call_operand.hbm [shape: f32[8,128], index: 9, kind: output, shape index: {}]  }
   0x1   :  { %v1107_v0 = vld [vmem:[%s1500_s1 + $0x40] sm:$0xff]   ;;  %v1111_v4 = vld [vmem:[%s1500_s1 + $0x48] sm:$0xff]   ;;  %v1115_v8 = vld [vmem:[%s1500_s1 + $0x50] sm:$0xff]  }
   0x2   :  { %v1108_v1 = vld [vmem:[%s1500_s1] sm:$0xff]   ;;  %979 = vmatprep.subr.bf16.mxu0 %v1107_v0  ;;  %v1112_v5 = vld [vmem:[%s1500_s1 + $0x8] sm:$0xff]   ;;  %v1116_v9 = vld [vmem:[%s1500_s1 + $0x10] sm:$0xff]  }
   0x3   :  { %v1109_v2 = vld [vmem:[%s1500_s1 + $0xc0] sm:$0xff]   ;;  %980 = vmatpush3.bf16.msra.mxu0 %v1108_v1  ;;  %v1113_v6 = vld [vmem:[%s1500_s1 + $0xc8] sm:$0xff]   ;;  %v1117_v10 = vld [vmem:[%s1500_s1 + $0xd0] sm:$0xff]  }
   0x4   :  { %v1110_v3 = vld [vmem:[%s1500_s1 + $0x80] sm:$0xff]   ;;  %1001 = vmatprep.subr.bf16.mxu1 %v1109_v2  ;;  %981 = vmatprep.subr.bf16.mxu0 %v1111_v4  ;;  %v1114_v7 = vld [vmem:[%s1500_s1 + $0x88] sm:$0xff]   ;;  %v1118_v11 = vld [vmem:[%s1500_s1 + $0x90] sm:$0xff]  }
   0x5   :  { %1002 = vmatpush3.bf16.msra.mxu1 %v1110_v3  ;;  %v1119_v12 = vld [vmem:[%s1500_s1 + $0x58] sm:$0xff]   ;;  %v1123_v16 = vld [vmem:[%s1500_s1 + $0x60] sm:$0xff]   ;;  %v1127_v20 = vld [vmem:[%s1500_s1 + $0x68] sm:$0xff]  }
   0x6   :  { %1003 = vmatprep.subr.bf16.mxu1 %v1113_v6  ;;  %v1120_v13 = vld [vmem:[%s1500_s1 + $0x18] sm:$0xff]   ;;  %v1124_v17 = vld [vmem:[%s1500_s1 + $0x20] sm:$0xff]   ;;  %v1128_v21 = vld [vmem:[%s1500_s1 + $0x28] sm:$0xff]  }
   0x7   :  { %982 = vmatpush3.bf16.msra.mxu0 %v1112_v5  ;;  %v1121_v14 = vld [vmem:[%s1500_s1 + $0xd8] sm:$0xff]   ;;  %v1125_v18 = vld [vmem:[%s1500_s1 + $0xe0] sm:$0xff]   ;;  %v1129_v22 = vld [vmem:[%s1500_s1 + $0xe8] sm:$0xff]  }
   0x8   :  { %983 = vmatprep.subr.bf16.mxu0 %v1115_v8  ;;  %v1122_v15 = vld [vmem:[%s1500_s1 + $0x98] sm:$0xff]   ;;  %v1126_v19 = vld [vmem:[%s1500_s1 + $0xa0] sm:$0xff]   ;;  %v1130_v23 = vld [vmem:[%s1500_s1 + $0xa8] sm:$0xff]  }
   0x9   :  { %1004 = vmatpush3.bf16.msra.mxu1 %v1114_v7  ;;  %v1131_v24 = vld [vmem:[%s1500_s1 + $0x70] sm:$0xff]   ;;  %v1135_v28 = vld [vmem:[%s1500_s1 + $0x78] sm:$0xff]   ;;  %v34_v31 = vld [vmem:[%s1499_s0] sm:$0xff] }
   0xa   :  { %1005 = vmatprep.subr.bf16.mxu1 %v1117_v10  ;;  %v1132_v25 = vld [vmem:[%s1500_s1 + $0x30] sm:$0xff]   ;;  %v1136_v29 = vld [vmem:[%s1500_s1 + $0x38] sm:$0xff]   ;;  %v904_v32 = vcombine.low %v34_v31, %v34_v31  ;;  %v905_v33 = vcombine.high %v34_v31, %v34_v31  ;;  %v1141_v35 = vld [vmem:[%s1500_s1 + $0x140] sm:$0xff]  }
   0xb   :  { %984 = vmatpush3.bf16.msra.mxu0 %v1116_v9  ;;  %v1133_v26 = vld [vmem:[%s1500_s1 + $0xf0] sm:$0xff]   ;;  %v1137_v30 = vld [vmem:[%s1500_s1 + $0xf8] sm:$0xff]   ;;  %v35_v36 = vld [vmem:[%s1499_s0 + $0x8] sm:$0xff] }
   0xc   :  { %985 = vmatprep.subr.bf16.mxu0 %v1119_v12  ;;  %v1134_v27 = vld [vmem:[%s1500_s1 + $0xb0] sm:$0xff]   ;;  %v1140_v34 = vld [vmem:[%s1500_s1 + $0xb8] sm:$0xff]   ;;  %497 = vmatprep.mubr.bf16.mxu0 %v905_v33  ;;  %v906_v37 = vcombine.low %v35_v36, %v35_v36  ;;  %v907_v38 = vcombine.high %v35_v36, %v35_v36  ;;  %v1144_v39 = vld [vmem:[%s1500_s1 + $0x100] sm:$0xff]  }
   0xd   :  { %1006 = vmatpush3.bf16.msra.mxu1 %v1118_v11  ;;  %v1145_v40 = vld [vmem:[%s1500_s1 + $0x148] sm:$0xff]   ;;  %v1147_v42 = vld [vmem:[%s1500_s1 + $0x150] sm:$0xff]   ;;  %v1149_v45 = vld [vmem:[%s1500_s1 + $0x158] sm:$0xff]  }
   0xe   :  { %1007 = vmatprep.subr.bf16.mxu1 %v1121_v14  ;;  %537 = vmatprep.mubr.bf16.mxu1 %v907_v38  ;;  %v1146_v41 = vld [vmem:[%s1500_s1 + $0x108] sm:$0xff]   ;;  %v1148_v44 = vld [vmem:[%s1500_s1 + $0x110] sm:$0xff]   ;;  %v1150_v46 = vld [vmem:[%s1500_s1 + $0x118] sm:$0xff]  }
   0xf   :  { %986 = vmatpush3.bf16.msra.mxu0 %v1120_v13  ;;  %v1151_v47 = vld [vmem:[%s1500_s1 + $0x160] sm:$0xff]   ;;  %v1153_v49 = vld [vmem:[%s1500_s1 + $0x168] sm:$0xff]   ;;  %v36_v51 = vld [vmem:[%s1499_s0 + $0x10] sm:$0xff] }
  0x10   :  { %987 = vmatprep.subr.bf16.mxu0 %v1123_v16  ;;  %v1152_v48 = vld [vmem:[%s1500_s1 + $0x120] sm:$0xff]   ;;  %v1154_v52 = vld [vmem:[%s1500_s1 + $0x128] sm:$0xff]   ;;  %v909_v53 = vcombine.high %v36_v51, %v36_v51  ;;  %v1162_v54 = vld [vmem:[%s1499_s0 + $0x18] ss:$0 sps:$4 sm:$0xff]  }
  0x11   :  { %1008 = vmatpush3.bf16.msra.mxu1 %v1122_v15  ;;  %v1159_v50 = vld [vmem:[%s1500_s1 + $0x180] sm:$0xff]   ;;  %v1155_v55 = vld [vmem:[%s1500_s1 + $0x170] sm:$0xff]   ;;  %v1157_v57 = vld [vmem:[%s1500_s1 + $0x178] sm:$0xff]  }
  0x12   :  { %1009 = vmatprep.subr.bf16.mxu1 %v1125_v18  ;;  %v1156_v56 = vld [vmem:[%s1500_s1 + $0x130] sm:$0xff]  }
  0x13   :  { %988 = vmatpush3.bf16.msra.mxu0 %v1124_v17 }
  0x14   :  { %989 = vmatprep.subr.bf16.mxu0 %v1127_v20 }
  0x15   :  { %1010 = vmatpush3.bf16.msra.mxu1 %v1126_v19 }
  0x16   :  { %1011 = vmatprep.subr.bf16.mxu1 %v1129_v22 }
  0x17   :  { %990 = vmatpush3.bf16.msra.mxu0 %v1128_v21 }
  0x18   :  { %991 = vmatprep.subr.bf16.mxu0 %v1131_v24 }
  0x19   :  { %1012 = vmatpush3.bf16.msra.mxu1 %v1130_v23 }
  0x1a   :  { %1013 = vmatprep.subr.bf16.mxu1 %v1133_v26 }
  0x1b   :  { %992 = vmatpush3.bf16.msra.mxu0 %v1132_v25 }
  0x1c   :  { %993 = vmatprep.subr.bf16.mxu0 %v1135_v28 }
  0x1d   :  { %1014 = vmatpush3.bf16.msra.mxu1 %v1134_v27 }
  0x1e   :  { %1015 = vmatprep.subr.bf16.mxu1 %v1137_v30 }
  0x1f   :  { %994 = vmatpush3.bf16.msra.mxu0 %v1136_v29 }
  0x20   :  { %1023 = vmatprep.subr.bf16.mxu0 %v1141_v35 }
  0x21   :  { %1016 = vmatpush3.bf16.msra.mxu1 %v1140_v34 }
  0x22   :  { %498 = vmatmul.mubr.bf16.vlgmr.msra.gmra.mrb[0].mxu0 %v904_v32  ;;  %1062 = vmatprep.subr.bf16.mxu1 %v1203_v43 }
  0x23   :  { %1024 = vmatpush3.bf16.msra.mxu0 %v1144_v39  ;;  %577 = vmatprep.mubr.bf16.mxu0 %v909_v53 }
  0x24   :  { %538 = vmatmul.mubr.bf16.vlgmr.msra.gmra.mrb[0].mxu1 %v906_v37  ;;  %1025 = vmatprep.subr.bf16.mxu0 %v1145_v40 }
  0x25   :  { %1064 = vmatprep.mubr.msk.bf16.mxu1 %vm1204_vm0, %v1203_v43  ;;  %1063 = vmatpush3.bf16.msra.mxu1 %v1159_v50 }
  0x26   :  { %1068 = vmatprep.subr.bf16.mxu1 %v1203_v43 }
  0x27   :  { %1026 = vmatpush3.bf16.msra.mxu0 %v1146_v41 }
  0x28   :  { %1027 = vmatprep.subr.bf16.mxu0 %v1147_v42 }
  0x2b   :  { %1028 = vmatpush3.bf16.msra.mxu0 %v1148_v44 }
  0x2c   :  { %1029 = vmatprep.subr.bf16.mxu0 %v1149_v45  ;;  %1065 = vmatmul.mubr.msk.bf16.vlgmr.msra.gmra.mrb[4].mxu1 %vm461_vm1, %v1162_v54 }
  0x2d   :  { %1076 = vmatprep.mubr.msk.bf16.mxu1 %vm1204_vm0, %v1203_v43 }
  0x2f   :  { %1030 = vmatpush3.bf16.msra.mxu0 %v1150_v46 }
  0x30   :  { %1031 = vmatprep.subr.bf16.mxu0 %v1151_v47 }
  0x33   :  { %1032 = vmatpush3.bf16.msra.mxu0 %v1152_v48 }
  0x34   :  { %1033 = vmatprep.subr.bf16.mxu0 %v1153_v49 }
  0x37   :  { %1034 = vmatpush3.bf16.msra.mxu0 %v1154_v52 }
  0x38   :  { %1035 = vmatprep.subr.bf16.mxu0 %v1155_v55 }
  0x39   :  { %14 = vsyncpa [#allocation3], 0  ;;  %v1158_v58 = vld [vmem:[%s1500_s1 + $0x138] sm:$0xff]   ;;  %v908_v59 = vcombine.low %v36_v51, %v36_v51  ;;  %v1163_v60 = vld [vmem:[%s1502_s3] sm:$0xff]   ;;  %vm666_vm2 = vcmask 523264  }
  0x3a   :  { %1069 = vmatpush3.bf16.msra.mxu1 %v1163_v60  ;;  %v1164_v61 = vld [vmem:[%s1502_s3 + $0x8] sm:$0xff]   ;;  %v1165_v62 = vld [vmem:[%s1502_s3 + $0x10] sm:$0xff]   ;;  %v1166_v63 = vld [vmem:[%s1502_s3 + $0x18] sm:$0xff]  }
  0x3b   :  { %1036 = vmatpush3.bf16.msra.mxu0 %v1156_v56  ;;  %1070 = vmatprep.subr.bf16.mxu1 %v1203_v43  ;;  %v903_v1 = vld [vmem:[%s1501_s2] ss:$0 sm:$0xff]  ;;  %v1168_v27 = vld [vmem:[%s1504_s5 + $0x8] sm:$0xff]   ;;  %v1169_v28 = vld [vmem:[%s1504_s5 + $0x10] sm:$0xff]  }
  0x3c   :  { %1037 = vmatprep.subr.bf16.mxu0 %v1157_v57  ;;  %v1167_v25 = vld [vmem:[%s1504_s5] sm:$0xff]   ;;  %v1170_v29 = vld [vmem:[%s1504_s5 + $0x18] sm:$0xff]   ;;  %v1172_v31 = vld [vmem:[%s1506_s7 + $0x8] sm:$0xff]  }
  0x3d   :  { %v1171_v30 = vld [vmem:[%s1506_s7] sm:$0xff]   ;;  %v1173_v40 = vld [vmem:[%s1506_s7 + $0x10] sm:$0xff]   ;;  %v1174_v41 = vld [vmem:[%s1506_s7 + $0x18] sm:$0xff]  }
  0x3e   :  { %1071 = vmatpush3.bf16.msra.mxu1 %v1164_v61  ;;  %v961_v32 = vld [vmem:[%s1503_s4] ss:$0 sm:$0xff] }
  0x3f   :  { %1038 = vmatpush3.bf16.msra.mxu0 %v1158_v58  ;;  %1072 = vmatprep.subr.bf16.mxu1 %v1203_v43  ;;  %v967_v42 = vld [vmem:[%s1505_s6] ss:$0 sm:$0xff]  ;;  %s1205_s6 = smov [#allocation2]  }
  0x40   :  { %1092 = vmatprep.subr.bf16.mxu0 %v1203_v43  ;;  %s895_s7 = sshll.u32 %s1205_s6, 4  ;;  %s896_s7 = int_to_ptr.vmem [resolvable:$true] %s895_s7 }
  0x41   :  { %p1184_p1 = scmp.lt.s32.totalorder %s896_s7, %s896_s7 }
  0x42   :  { %578 = vmatmul.mubr.bf16.vlgmr.msra.gmra.mrb[4].mxu0 %v908_v59  ;;  %1073 = vmatpush3.bf16.msra.mxu1 %v1165_v62 }
  0x43   :  { %1100 = vmatprep.mubr.msk.bf16.mxu0 %vm1204_vm0, %v1203_v43  ;;  %1074 = vmatprep.subr.bf16.mxu1 %v1203_v43 }
  0x44   :  { %1093 = vmatpush3.bf16.msra.mxu0 %v1171_v30 }
  0x45   :  { %1094 = vmatprep.subr.bf16.mxu0 %v1203_v43 }
  0x46   :  { %1075 = vmatpush3.bf16.msra.mxu1 %v1166_v63 }
  0x47   :  { %1080 = vmatprep.subr.bf16.mxu1 %v1203_v43 }
  0x48   :  { %1095 = vmatpush3.bf16.msra.mxu0 %v1172_v31 }
  0x49   :  { %1096 = vmatprep.subr.bf16.mxu0 %v1203_v43 }
  0x4c   :  { %1097 = vmatpush3.bf16.msra.mxu0 %v1173_v40 }
  0x4d   :  { %1098 = vmatprep.subr.bf16.mxu0 %v1203_v43 }
  0x50   :  { %1099 = vmatpush3.bf16.msra.mxu0 %v1174_v41 }
  0xf5   :  { %v995_v0 = vpop.f32.mrb[0].mxu0 }
  0xf6   :  { %v996_v2 = vpop.f32.mrb[1].mxu0 }
  0xf7   :  { %v997_v3 = vadd.f32 %v996_v2, %v995_v0  ;;  %v998_v4 = vpop.f32.mrb[2].mxu0  ;;  %v1017_v5 = vpop.f32.mrb[0].mxu1 }
  0xf8   :  { %v999_v6 = vpop.f32.mrb[3].mxu0  ;;  %v1018_v7 = vpop.f32.mrb[1].mxu1 }
  0xf9   :  { %v500_v8 = vadd.f32 %v997_v3, %v903_v1  ;;  %v1019_v9 = vadd.f32 %v1018_v7, %v1017_v5  ;;  %v1020_v10 = vpop.f32.mrb[2].mxu1 }
  0xfa   :  { %v1021_v11 = vpop.f32.mrb[3].mxu1 }
  0xfb   :  { %v540_v12 = vadd.f32 %v1019_v9, %v500_v8 }
  0xff   :  { %v619_v13 = vpop.f32.mrb[4].mxu1 }
 0x100   :  { %v1066_v14 = vpop.f32.mrb[5].mxu1 }
 0x101   :  { %v622_v15 = vpop.f32.mrb[6].mxu1 }
 0x102   :  { %v1067_v16 = vpop.f32.mrb[7].mxu1 }
 0x115   :  { %v1039_v17 = vpop.f32.mrb[4].mxu0 }
 0x116   :  { %v1040_v18 = vpop.f32.mrb[5].mxu0 }
 0x117   :  { %v1041_v19 = vadd.f32 %v1040_v18, %v1039_v17  ;;  %v1042_v20 = vpop.f32.mrb[6].mxu0 }
 0x118   :  { %v1043_v21 = vpop.f32.mrb[7].mxu0 }
 0x119   :  { %v580_v22 = vadd.f32 %v1041_v19, %v540_v12 }
 0x11b   :  { %v620_v23 = vadd.f32 %v619_v13, %v580_v22 }
 0x11d   :  { %v625_v24 = vmax.f32 %v620_v23, 0.0 }
 0x11f   :  { %v626_v26 = vpack.c.bf16 %v625_v24, %v625_v24 }
 0x121   :  { %1077 = vmatmul.mubr.msk.bf16.vlgmr.msra.gmra.mrb[8].mxu1 %vm666_vm2, %v626_v26 }
 0x122   :  { %1081 = vmatpush3.bf16.msra.mxu1 %v1167_v25  ;;  %1088 = vmatprep.mubr.msk.bf16.mxu1 %vm1204_vm0, %v1203_v43 }
 0x123   :  { %1082 = vmatprep.subr.bf16.mxu1 %v1203_v43 }
 0x126   :  { %1083 = vmatpush3.bf16.msra.mxu1 %v1168_v27 }
 0x127   :  { %1084 = vmatprep.subr.bf16.mxu1 %v1203_v43 }
 0x12a   :  { %1085 = vmatpush3.bf16.msra.mxu1 %v1169_v28 }
 0x12b   :  { %1086 = vmatprep.subr.bf16.mxu1 %v1203_v43  ;;  %v973_v43 = vld [vmem:[%s1507_s8] ss:$0 sm:$0xff]  ;;  %s1179_s8 = scalar_lea.vmem %s896_s7, 128 }
 0x12c   :  { %p1180_p0 = scmp.ne.s32.totalorder %s896_s7, %s1179_s8  ;;  %p1185_p2 = scmp.lt.s32.totalorder %s1179_s8, %s1179_s8 }
 0x12e   :  { %1087 = vmatpush3.bf16.msra.mxu1 %v1170_v29  ;;  %p1186_p3 = por %p1185_p2, %p1184_p1 }
 0x130   :  { %p1187_p4 = pnand %p1186_p3, %p1180_p0 }
 0x1f4   :  { %v704_v33 = vpop.f32.mrb[8].mxu1 }
 0x1f5   :  { %v705_v34 = vadd.f32 %v961_v32, %v704_v33  ;;  %v1078_v35 = vpop.f32.mrb[9].mxu1 }
 0x1f6   :  { %v707_v36 = vpop.f32.mrb[10].mxu1 }
 0x1f7   :  { %v710_v37 = vmax.f32 %v705_v34, 0.0  ;;  %v1079_v38 = vpop.f32.mrb[11].mxu1 }
 0x1f9   :  { %v711_v39 = vpack.c.bf16 %v710_v37, %v710_v37 }
 0x1fb   :  { %1089 = vmatmul.mubr.msk.bf16.vlgmr.msra.gmra.mrb[12].mxu1 %vm666_vm2, %v711_v39 }
 0x2ce   :  { %v788_v44 = vpop.f32.mrb[12].mxu1 }
 0x2cf   :  { %v789_v45 = vadd.f32 %v967_v42, %v788_v44  ;;  %v1090_v46 = vpop.f32.mrb[13].mxu1 }
 0x2d0   :  { %v791_v47 = vpop.f32.mrb[14].mxu1 }
 0x2d1   :  { %v794_v48 = vmax.f32 %v789_v45, 0.0  ;;  %v1091_v49 = vpop.f32.mrb[15].mxu1 }
 0x2d3   :  { %v795_v50 = vpack.c.bf16 %v794_v48, %v794_v48 }
 0x2d5   :  { %1101 = vmatmul.mubr.msk.bf16.vlgmr.msra.gmra.mrb[8].mxu0 %vm666_vm2, %v795_v50 }
 0x3a8   :  { %v872_v51 = vpop.f32.mrb[8].mxu0 }
 0x3a9   :  { %v873_v52 = vadd.f32 %v973_v43, %v872_v51  ;;  %v1102_v53 = vpop.f32.mrb[9].mxu0 }
 0x3aa   :  { %v875_v54 = vpop.f32.mrb[10].mxu0 }
 0x3ab   :  { %878 = vmax.xlane.f32.xlu0 %v873_v52  ;;  %v1103_v55 = vpop.f32.mrb[11].mxu0 }
 0x438   :  { %v879_v56 = vpop.xlane.xlu0 %878 }
 0x439   :  { %v880_v57 = vsub.f32 %v873_v52, %v879_v56 }
 0x43b   :  { %v881_v58 = vmul.f32 1.442695, %v880_v57 }
 0x43d   :  { %1175 = vpow2.f32 %v881_v58 }
 0x447   :  { %v1176_v59 = vpop.eup %1175 }
 0x448   :  { %883 = vadd.xlane.f32.xlu0 %v1176_v59 }
 0x4d5   :  { %v884_v60 = vpop.xlane.xlu0 %883 }
 0x4d6   :  { %1177 = vlog2.f32 %v884_v60 }
 0x4e0   :  { %v1178_v61 = vpop.eup %1177 }
 0x4e1   :  { %v886_v62 = vmul.f32 0.6931472, %v1178_v61 }
 0x4e3   :  { %v887_v63 = vsub.f32 %v880_v57, %v886_v62 }
 0x4e5   :  { %888 = vst [vmem:[#allocation2] sm:$0xff] %v887_v63 }
 0x4e6   :  { %1190 = shalt.err (!%p1187_p4)
}
 0x4e7   :  { %s1191_s15 = scalar_lea.hbm %s1508_s9, 128 }
 0x4e8   :  { %p1192_p5 = scmp.ne.s32.totalorder %s1508_s9, %s1191_s15  ;;  %p1195_p6 = scmp.lt.u32.totalorder %s1191_s15, %s1508_s9 }
 0x4ea   :  { %p1197_p7 = pnand %p1195_p6, %p1192_p5 }
 0x4ec   :  { %1200 = shalt.err (!%p1197_p7)
}
 0x4ed   :  { %898 = dma.vmem_to_hbm [thread:$0]  %s896_s7, 128, %s1508_s9, [#allocation3]  }
 0x4ee   :  { %1201 = dma.done.wait [#allocation3], 128  }
 0x4ef   :  { %1202 = vsyncadd [#allocation3], 4294967168 }
 0x4f0   :  { %902 = vsyncpa [#allocation3], 1 }

</bundles_post_ra>
